<compile_context>
chip_gen: v7x
topology: tpu7x:2x2x1
jax: 0.10.0
libtpu: 0.0.40
codegen_flags: <defaults>
</compile_context>

<pallas_src>
import jax
import jax.numpy as jnp
from jax.experimental import pallas as pl
from jax.experimental.pallas import tpu as pltpu


def _round_up(n, m):
    return (n + m - 1) // m * m


def _head_kernel(x_ref, w1_ref, b1_ref, w2_ref, b2_ref, w3_ref, b3_ref,
                 x1_ref, x2_ref, x3_ref):
    # Dropout is identity at inference time, so it is omitted.
    x = x_ref[...]

    h1 = jnp.dot(x, w1_ref[...], preferred_element_type=jnp.float32) + b1_ref[...]
    x1 = jnp.tanh(h1)                                   # f32, EUP
    x1_ref[...] = x1.astype(x1_ref.dtype)

    h2 = jnp.dot(x1.astype(w2_ref.dtype), w2_ref[...],
                 preferred_element_type=jnp.float32) + b2_ref[...]
    x2 = jnp.tanh(h2)
    x2_ref[...] = x2.astype(x2_ref.dtype)

    h3 = jnp.dot(x2.astype(w3_ref.dtype), w3_ref[...],
                 preferred_element_type=jnp.float32) + b3_ref[...]
    x3_ref[...] = h3.astype(x3_ref.dtype)


def wav2vec2_classification_head(features, params, *, batch_tile=512,
                                 compute_dtype=None, out_dtype=None):
    """features: [B, hidden_size].

    params: dict of (w, b) per layer with weights transposed to [in, out] and
    biases shaped [1, out] (f32).

    compute_dtype: if set (e.g. jnp.bfloat16 on v6e/v7x), features and weights
    are pre-cast in the wrapper so the DMA moves bf16 and the MXU runs at bf16
    rate; accumulation and biases stay f32.  Default (None) keeps everything
    f32 (bit-identical to the PyTorch module in eval mode).

    out_dtype: dtype of the three outputs (default: features.dtype).  Pass
    jnp.bfloat16 on bandwidth-bound chips (v5e) if consumers allow it.
    """
    w1, b1 = params["dense1"]
    w2, b2 = params["dense2"]
    w3, b3 = params["out_proj"]

    B, H = features.shape
    d1 = w1.shape[1]          # 300
    d2 = w2.shape[1]          # 100
    nl = w3.shape[1]          # num_labels

    out_dtype = features.dtype if out_dtype is None else out_dtype

    # Optional mixed precision: cast once in the wrapper (shrinks HBM traffic),
    # never inside the kernel on freshly-DMA'd f32 data.
    if compute_dtype is not None and compute_dtype != features.dtype:
        x_in = features.astype(compute_dtype)
        w1c = w1.astype(compute_dtype)
        w2c = w2.astype(compute_dtype)
        w3c = w3.astype(compute_dtype)
    else:
        x_in, w1c, w2c, w3c = features, w1, w2, w3

    # Batch tile: multiple of 8 sublanes, capped at batch_tile, and capped at
    # ~half the batch so the grid has >= 2 steps whenever B allows it (lets
    # dimension_semantics=("parallel",) split work across v7x's 2 TensorCores).
    half = _round_up(pl.cdiv(_round_up(B, 8), 2), 8)
    TB = max(8, min(batch_tile, half))
    grid = (pl.cdiv(B, TB),)      # final block may be partial; rows independent

    tiled = lambda i: (i, 0)      # batch-tiled operands
    resident = lambda i: (0, 0)   # weights / biases stay VMEM-resident

    flops = 2 * B * (H * d1 + d1 * d2 + d2 * nl)
    transcendentals = B * (d1 + d2)
    bytes_accessed = (
        B * H * jnp.dtype(x_in.dtype).itemsize
        + (H * d1 + d1 * d2 + d2 * nl) * jnp.dtype(w1c.dtype).itemsize
        + (d1 + d2 + nl) * 4
        + B * (d1 + d2 + nl) * jnp.dtype(out_dtype).itemsize
    )

    return pl.pallas_call(
        _head_kernel,
        out_shape=(
            jax.ShapeDtypeStruct((B, d1), out_dtype),
            jax.ShapeDtypeStruct((B, d2), out_dtype),
            jax.ShapeDtypeStruct((B, nl), out_dtype),
        ),
        grid_spec=pltpu.PrefetchScalarGridSpec(
            num_scalar_prefetch=0,
            grid=grid,
            in_specs=[
                pl.BlockSpec((TB, H), tiled),       # features tile
                pl.BlockSpec((H, d1), resident),    # W1
                pl.BlockSpec((1, d1), resident),    # b1 (f32)
                pl.BlockSpec((d1, d2), resident),   # W2
                pl.BlockSpec((1, d2), resident),    # b2 (f32)
                pl.BlockSpec((d2, nl), resident),   # W3
                pl.BlockSpec((1, nl), resident),    # b3 (f32)
            ],
            out_specs=[
                pl.BlockSpec((TB, d1), tiled),
                pl.BlockSpec((TB, d2), tiled),
                pl.BlockSpec((TB, nl), tiled),
            ],
        ),
        compiler_params=pltpu.CompilerParams(
            dimension_semantics=("parallel",),
            vmem_limit_bytes=32 * 1024 * 1024,
        ),
        cost_estimate=pl.CostEstimate(
            flops=flops,
            transcendentals=transcendentals,
            bytes_accessed=bytes_accessed,
        ),
    )(x_in, w1c, b1, w2c, b2, w3c, b3)


def _init_linear(key, fan_in, fan_out):
    """Deterministic PyTorch-style nn.Linear init (uniform +-1/sqrt(fan_in)),
    returned as ([in, out] weight, [1, out] bias)."""
    kw, kb = jax.random.split(key)
    bound = 1.0 / (fan_in ** 0.5)
    w = jax.random.uniform(kw, (fan_in, fan_out), jnp.float32, -bound, bound)
    b = jax.random.uniform(kb, (1, fan_out), jnp.float32, -bound, bound)
    return w, b


if __name__ == "__main__":
    # Small, module-consistent shapes: batch=4, hidden_size=32, num_labels=6.
    batch = 4
    hidden_size = 32
    num_labels = 6

    key = jax.random.PRNGKey(0)
    k_x, k1, k2, k3 = jax.random.split(key, 4)

    features = jax.random.normal(k_x, (batch, hidden_size), jnp.float32)

    params = {
        "dense1": _init_linear(k1, hidden_size, 300),
        "dense2": _init_linear(k2, 300, 100),
        "out_proj": _init_linear(k3, 100, num_labels),
    }

    # Reference in plain JAX (same math, eval-mode dropout = identity).
    w1, b1 = params["dense1"]
    w2, b2 = params["dense2"]
    w3, b3 = params["out_proj"]
    r1 = jnp.tanh(features @ w1 + b1)
    r2 = jnp.tanh(r1 @ w2 + b2)
    r3 = r2 @ w3 + b3

    # 1) Default f32 path — matches PyTorch bit-for-bit (tight tolerance).
    x1, x2, x3 = wav2vec2_classification_head(features, params)
    jax.block_until_ready((x1, x2, x3))

    assert x1.shape == (batch, 300)
    assert x2.shape == (batch, 100)
    assert x3.shape == (batch, num_labels)
    assert jnp.allclose(x1, r1, atol=1e-5)
    assert jnp.allclose(x2, r2, atol=1e-5)
    assert jnp.allclose(x3, r3, atol=1e-5)

    # 2) bf16 compute path (wrapper pre-cast, f32 accumulation) — looser check.
    y1, y2, y3 = wav2vec2_classification_head(
        features, params, compute_dtype=jnp.bfloat16)
    jax.block_until_ready((y1, y2, y3))
    assert jnp.allclose(y1, r1, atol=1e-1)
    assert jnp.allclose(y2, r2, atol=1e-1)
    assert jnp.allclose(y3, r3, atol=1e-1)

    print("KERNEL_OK")
</pallas_src>

<mosaic_0001>
module attributes {stable_mosaic.version = 11 : i64} {
  func.func @_head_kernel(%arg0: i32, %arg1: memref<8x32xf32, #tpu.memory_space<vmem>>, %arg2: memref<32x300xf32, #tpu.memory_space<vmem>>, %arg3: memref<1x300xf32, #tpu.memory_space<vmem>>, %arg4: memref<300x100xf32, #tpu.memory_space<vmem>>, %arg5: memref<1x100xf32, #tpu.memory_space<vmem>>, %arg6: memref<100x6xf32, #tpu.memory_space<vmem>>, %arg7: memref<1x6xf32, #tpu.memory_space<vmem>>, %arg8: memref<8x300xf32, #tpu.memory_space<vmem>>, %arg9: memref<8x100xf32, #tpu.memory_space<vmem>>, %arg10: memref<8x6xf32, #tpu.memory_space<vmem>>) attributes {dimension_semantics = [#tpu.dimension_semantics<parallel>], iteration_bounds = array<i64: 1>, scalar_prefetch = 0 : i64, scratch_operands = 0 : i64, tpu.core_type = #tpu.core_type<tc>, window_params = [{transform_indices = @transform_0, window_bounds = array<i64: 8, 32>}, {pipeline_mode = #tpu.pipeline_mode<synchronous>, transform_indices = @transform_1, window_bounds = array<i64: 32, 300>}, {pipeline_mode = #tpu.pipeline_mode<synchronous>, transform_indices = @transform_2, window_bounds = array<i64: 1, 300>}, {pipeline_mode = #tpu.pipeline_mode<synchronous>, transform_indices = @transform_3, window_bounds = array<i64: 300, 100>}, {pipeline_mode = #tpu.pipeline_mode<synchronous>, transform_indices = @transform_4, window_bounds = array<i64: 1, 100>}, {pipeline_mode = #tpu.pipeline_mode<synchronous>, transform_indices = @transform_5, window_bounds = array<i64: 100, 6>}, {pipeline_mode = #tpu.pipeline_mode<synchronous>, transform_indices = @transform_6, window_bounds = array<i64: 1, 6>}, {transform_indices = @transform_7, window_bounds = array<i64: 8, 300>}, {transform_indices = @transform_8, window_bounds = array<i64: 8, 100>}, {transform_indices = @transform_9, window_bounds = array<i64: 8, 6>}]} {
    %c0 = arith.constant 0 : index
    %c0_0 = arith.constant 0 : index
    %0 = vector.load %arg1[%c0, %c0_0] : memref<8x32xf32, #tpu.memory_space<vmem>>, vector<8x32xf32>
    %c0_1 = arith.constant 0 : index
    %c0_2 = arith.constant 0 : index
    %1 = vector.load %arg2[%c0_1, %c0_2] : memref<32x300xf32, #tpu.memory_space<vmem>>, vector<32x300xf32>
    %cst = arith.constant dense<0.000000e+00> : vector<8x300xf32>
    %2 = tpu.matmul %0, %1, %cst {dimension_numbers = #tpu.dot_dimension_numbers<[1], [0], [0], [1], [0, 0, 1, 1], [], []>} : vector<8x32xf32>, vector<32x300xf32>, vector<8x300xf32> -> vector<8x300xf32>
    %c0_3 = arith.constant 0 : index
    %c0_4 = arith.constant 0 : index
    %3 = vector.load %arg3[%c0_3, %c0_4] : memref<1x300xf32, #tpu.memory_space<vmem>>, vector<1x300xf32>
    %4 = vector.broadcast %3 : vector<1x300xf32> to vector<8x300xf32>
    %5 = arith.addf %2, %4 : vector<8x300xf32>
    %6 = math.tanh %5 : vector<8x300xf32>
    %c0_5 = arith.constant 0 : index
    %c0_6 = arith.constant 0 : index
    %7 = vector.load %arg8[%c0_5, %c0_6] : memref<8x300xf32, #tpu.memory_space<vmem>>, vector<8x300xf32>
    tpu.vector_store %arg8[%c0_5, %c0_6], %6 {strides = array<i32>} : memref<8x300xf32, #tpu.memory_space<vmem>>, vector<8x300xf32>,
    %c0_7 = arith.constant 0 : index
    %c0_8 = arith.constant 0 : index
    %8 = vector.load %arg4[%c0_7, %c0_8] : memref<300x100xf32, #tpu.memory_space<vmem>>, vector<300x100xf32>
    %cst_9 = arith.constant dense<0.000000e+00> : vector<8x100xf32>
    %9 = tpu.matmul %6, %8, %cst_9 {dimension_numbers = #tpu.dot_dimension_numbers<[1], [0], [0], [1], [0, 0, 1, 1], [], []>} : vector<8x300xf32>, vector<300x100xf32>, vector<8x100xf32> -> vector<8x100xf32>
    %c0_10 = arith.constant 0 : index
    %c0_11 = arith.constant 0 : index
    %10 = vector.load %arg5[%c0_10, %c0_11] : memref<1x100xf32, #tpu.memory_space<vmem>>, vector<1x100xf32>
    %11 = vector.broadcast %10 : vector<1x100xf32> to vector<8x100xf32>
    %12 = arith.addf %9, %11 : vector<8x100xf32>
    %13 = math.tanh %12 : vector<8x100xf32>
    %c0_12 = arith.constant 0 : index
    %c0_13 = arith.constant 0 : index
    %14 = vector.load %arg9[%c0_12, %c0_13] : memref<8x100xf32, #tpu.memory_space<vmem>>, vector<8x100xf32>
    tpu.vector_store %arg9[%c0_12, %c0_13], %13 {strides = array<i32>} : memref<8x100xf32, #tpu.memory_space<vmem>>, vector<8x100xf32>,
    %c0_14 = arith.constant 0 : index
    %c0_15 = arith.constant 0 : index
    %15 = vector.load %arg6[%c0_14, %c0_15] : memref<100x6xf32, #tpu.memory_space<vmem>>, vector<100x6xf32>
    %cst_16 = arith.constant dense<0.000000e+00> : vector<8x6xf32>
    %16 = tpu.matmul %13, %15, %cst_16 {dimension_numbers = #tpu.dot_dimension_numbers<[1], [0], [0], [1], [0, 0, 1, 1], [], []>} : vector<8x100xf32>, vector<100x6xf32>, vector<8x6xf32> -> vector<8x6xf32>
    %c0_17 = arith.constant 0 : index
    %c0_18 = arith.constant 0 : index
    %17 = vector.load %arg7[%c0_17, %c0_18] : memref<1x6xf32, #tpu.memory_space<vmem>>, vector<1x6xf32>
    %18 = vector.broadcast %17 : vector<1x6xf32> to vector<8x6xf32>
    %19 = arith.addf %16, %18 : vector<8x6xf32>
    %c0_19 = arith.constant 0 : index
    %c0_20 = arith.constant 0 : index
    %20 = vector.load %arg10[%c0_19, %c0_20] : memref<8x6xf32, #tpu.memory_space<vmem>>, vector<8x6xf32>
    tpu.vector_store %arg10[%c0_19, %c0_20], %19 {strides = array<i32>} : memref<8x6xf32, #tpu.memory_space<vmem>>, vector<8x6xf32>,
    return
  }
  func.func @transform_0(%arg0: i32) -> (i32, i32) {
    %c0_i32 = arith.constant 0 : i32
    %c0_i32_0 = arith.constant 0 : i32
    return %arg0, %c0_i32 : i32, i32
  }
  func.func @transform_1(%arg0: i32) -> (i32, i32) {
    %c0_i32 = arith.constant 0 : i32
    %c0_i32_0 = arith.constant 0 : i32
    %c0_i32_1 = arith.constant 0 : i32
    return %c0_i32, %c0_i32_0 : i32, i32
  }
  func.func @transform_2(%arg0: i32) -> (i32, i32) {
    %c0_i32 = arith.constant 0 : i32
    %c0_i32_0 = arith.constant 0 : i32
    %c0_i32_1 = arith.constant 0 : i32
    return %c0_i32, %c0_i32_0 : i32, i32
  }
  func.func @transform_3(%arg0: i32) -> (i32, i32) {
    %c0_i32 = arith.constant 0 : i32
    %c0_i32_0 = arith.constant 0 : i32
    %c0_i32_1 = arith.constant 0 : i32
    return %c0_i32, %c0_i32_0 : i32, i32
  }
  func.func @transform_4(%arg0: i32) -> (i32, i32) {
    %c0_i32 = arith.constant 0 : i32
    %c0_i32_0 = arith.constant 0 : i32
    %c0_i32_1 = arith.constant 0 : i32
    return %c0_i32, %c0_i32_0 : i32, i32
  }
  func.func @transform_5(%arg0: i32) -> (i32, i32) {
    %c0_i32 = arith.constant 0 : i32
    %c0_i32_0 = arith.constant 0 : i32
    %c0_i32_1 = arith.constant 0 : i32
    return %c0_i32, %c0_i32_0 : i32, i32
  }
  func.func @transform_6(%arg0: i32) -> (i32, i32) {
    %c0_i32 = arith.constant 0 : i32
    %c0_i32_0 = arith.constant 0 : i32
    %c0_i32_1 = arith.constant 0 : i32
    return %c0_i32, %c0_i32_0 : i32, i32
  }
  func.func @transform_7(%arg0: i32) -> (i32, i32) {
    %c0_i32 = arith.constant 0 : i32
    %c0_i32_0 = arith.constant 0 : i32
    return %arg0, %c0_i32 : i32, i32
  }
  func.func @transform_8(%arg0: i32) -> (i32, i32) {
    %c0_i32 = arith.constant 0 : i32
    %c0_i32_0 = arith.constant 0 : i32
    return %arg0, %c0_i32 : i32, i32
  }
  func.func @transform_9(%arg0: i32) -> (i32, i32) {
    %c0_i32 = arith.constant 0 : i32
    %c0_i32_0 = arith.constant 0 : i32
    return %arg0, %c0_i32 : i32, i32
  }
}

</mosaic_0001>

<bundles_post_ra>
// kernel: tpu_custom_call.1
= control target key start
LH: loop header
LB: loop body
LE: loop exit
PB: predicated region body
PF: predicated region fallthrough
CT: control target
= control target key end

     0   :  { %15 = vsyncpa [#allocation3], 0  ;;  %s1114_s0 = inlined_call_operand.vmem [shape: f32[4,32], index: 0, kind: input, shape index: {}]   ;;  %s1115_s1 = inlined_call_operand.vmem [shape: f32[32,300], index: 1, kind: input, shape index: {}]   ;;  %s1116_s2 = inlined_call_operand.vmem [shape: f32[1,300], index: 2, kind: input, shape index: {}]   ;;  %s1117_s3 = inlined_call_operand.hbm [shape: f32[300,100], index: 3, kind: input, shape index: {}]   ;;  %s1118_s4 = inlined_call_operand.vmem [shape: f32[1,100], index: 4, kind: input, shape index: {}]   ;;  %s1119_s5 = inlined_call_operand.vmem [shape: f32[100,6], index: 5, kind: input, shape index: {}]   ;;  %s1120_s6 = inlined_call_operand.vmem [shape: f32[1,6], index: 6, kind: input, shape index: {}]   ;;  %s1121_s7 = inlined_call_operand.hbm [shape: f32[4,300], index: 7, kind: output, shape index: {0}]   ;;  %s1122_s8 = inlined_call_operand.hbm [shape: f32[4,100], index: 8, kind: output, shape index: {1}]   ;;  %s1123_s9 = inlined_call_operand.hbm [shape: f32[4,6], index: 9, kind: output, shape index: {2}]  }
   0x1   :  { %16 = vsyncpa [#allocation4], 0 }
   0x2   :  { %17 = vsyncpa [#allocation7], 0  ;;  %s892_s30 = smov [#allocation2]   ;;  %s798_s13 = scalar_lea.hbm %s1117_s3, 4864 }
   0x3   :  { %s29_s10 = sshll.u32 %s892_s30, 4  ;;  %p799_p0 = scmp.ne.s32.totalorder %s1117_s3, %s798_s13  ;;  %s30_s10 = int_to_ptr.vmem [resolvable:$true] %s29_s10 }
   0x4   :  { %p802_p1 = scmp.lt.u32.totalorder %s798_s13, %s1117_s3 }
   0x6   :  { %p804_p2 = pnand %p802_p1, %p799_p0 }
   0x8   :  { %807 = shalt.err (!%p804_p2)
}
   0x9   :  { %s808_s18 = scalar_lea.vmem %s30_s10, 4864  ;;  %p813_p4 = scmp.lt.s32.totalorder %s30_s10, %s30_s10 }
   0xa   :  { %p809_p3 = scmp.ne.s32.totalorder %s30_s10, %s808_s18  ;;  %p814_p5 = scmp.lt.s32.totalorder %s808_s18, %s808_s18 }
   0xc   :  { %p815_p6 = por %p814_p5, %p813_p4 }
   0xe   :  { %p816_p7 = pnand %p815_p6, %p809_p3 }
  0x10   :  { %819 = shalt.err (!%p816_p7)
}
  0x11   :  { %s893_s19 = smov 128   ;;  %s894_s20 = smov 8  }
  0x12   :  { %35 = dma.hbm_to_vmem [thread:$0]  %s1117_s3, 4864, %s30_s10, [#allocation3], %s893_s19, %s893_s19, %s894_s20  }
  0x13   :  { %886 = dma.done.wait [#allocation3], 4864  }
  0x14   :  { %887 = vsyncadd [#allocation3], 4294962432  ;;  %v895_v0 = vmov 0.0|0.0   ;;  %v896_v1 = vmov 0.0   ;;  %vm897_vm0 = vmmov 0   ;;  %v47_v2 = vld [vmem:[%s1115_s1 + $0x8] sm:$0xff] }
  0x15   :  { %710 = vmatprep.subr.bf16.mxu1 %v895_v0  ;;  %143 = vmatprep.mubr.f32.mxu0 %v896_v1  ;;  %v50_v3 = vld [vmem:[%s1115_s1 + $0x20] sm:$0xff]  ;;  %v49_v6 = vld [vmem:[%s1115_s1 + $0x18] sm:$0xff]  ;;  %v56_v8 = vld [vmem:[%s1115_s1 + $0x50] sm:$0xff]  ;;  %vm75_vm1 = vcmask 261120   ;;  %vm285_vm2 = vcmask 1043456   ;;  %vm898_vm3 = vmmov 1  }
  0x16   :  { %655 = vmatprep.mubr.msk.f32.mxu1 %vm897_vm0, %v896_v1  ;;  %v46_v4 = vld [vmem:[%s1115_s1] sm:$0xff]  ;;  %v702_v5 = vpack.c.bf16 %v50_v3, %v47_v2  ;;  %v53_v7 = vld [vmem:[%s1115_s1 + $0x38] sm:$0xff]  ;;  %v52_v11 = vld [vmem:[%s1115_s1 + $0x30] sm:$0xff]  ;;  %vm233_vm5 = vcmask 355328   ;;  %vm282_vm6 = vcmask 359424   ;;  %vm430_vm7 = vcmask 818176  }
  0x17   :  { %v704_v9 = vpack.c.bf16 %v49_v6, %v46_v4  ;;  %v706_v10 = vpack.c.bf16 %v56_v8, %v53_v7  ;;  %v55_v12 = vld [vmem:[%s1115_s1 + $0x48] sm:$0xff]  ;;  %v48_v13 = vld [vmem:[%s1115_s1 + $0x10] sm:$0xff]  ;;  %v54_v15 = vld [vmem:[%s1115_s1 + $0x40] sm:$0xff]  ;;  %vm528_vm8 = vcmask 48128  }
  0x18   :  { %703 = vmatprep.subr.bf16.mxu0 %v702_v5  ;;  %v51_v14 = vld [vmem:[%s1115_s1 + $0x28] sm:$0xff]  ;;  %v708_v16 = vpack.c.bf16 %v55_v12, %v52_v11  ;;  %v57_v18 = vld [vmem:[%s1115_s1 + $0x58] sm:$0xff]  ;;  %v253_v19 = vld [vmem:[#allocation2 + $0x80] sm:$0xff] }
  0x19   :  { %705 = vmatpush1.bf16.msra.mxu0 %v704_v9  ;;  %v711_v17 = vpack.c.bf16 %v51_v14, %v48_v13  ;;  %v254_v20 = vld [vmem:[#allocation2 + $0x88] sm:$0xff]  ;;  %v237_v22 = vld [vmem:[#allocation2] sm:$0xff]  ;;  %v714_v24 = vpack.c.bf16 %v57_v18, %v54_v15  ;;  %v255_v25 = vld [vmem:[#allocation2 + $0x90] sm:$0xff] }
  0x1a   :  { %707 = vmatprep.subr.bf16.mxu0 %v706_v10  ;;  %v716_v21 = vpack.c.bf16 %v254_v20, %v253_v19  ;;  %v238_v23 = vld [vmem:[#allocation2 + $0x8] sm:$0xff]  ;;  %v256_v26 = vld [vmem:[#allocation2 + $0x98] sm:$0xff]  ;;  %v45_v27 = vld [vmem:[%s1114_s0] sm:$0xff] }
  0x1b   :  { %712 = vmatpush3.bf16.msra.mxu1 %v711_v17  ;;  %v718_v28 = vpack.c.bf16 %v238_v23, %v237_v22  ;;  %v720_v29 = vpack.c.bf16 %v256_v26, %v255_v25  ;;  %v239_v30 = vld [vmem:[#allocation2 + $0x10] sm:$0xff]  ;;  %v240_v31 = vld [vmem:[#allocation2 + $0x18] sm:$0xff]  ;;  %v257_v32 = vld [vmem:[#allocation2 + $0xa0] sm:$0xff] }
  0x1c   :  { %713 = vmatprep.subr.bf16.mxu1 %v895_v0  ;;  %v258_v33 = vld [vmem:[#allocation2 + $0xa8] sm:$0xff]  ;;  %v722_v34 = vpack.c.bf16 %v240_v31, %v239_v30  ;;  %v241_v36 = vld [vmem:[#allocation2 + $0x20] sm:$0xff]  ;;  %v259_v38 = vld [vmem:[#allocation2 + $0xb0] sm:$0xff] }
  0x1d   :  { %709 = vmatpush1.bf16.msra.mxu0 %v708_v16  ;;  %v724_v35 = vpack.c.bf16 %v258_v33, %v257_v32  ;;  %v242_v37 = vld [vmem:[#allocation2 + $0x28] sm:$0xff]  ;;  %v260_v39 = vld [vmem:[#allocation2 + $0xb8] sm:$0xff]  ;;  %v243_v42 = vld [vmem:[#allocation2 + $0x30] sm:$0xff]  ;;  %v60_v16 = vlaneseq }
  0x1e   :  { %717 = vmatprep.subr.bf16.mxu0 %v716_v21  ;;  %v726_v40 = vpack.c.bf16 %v242_v37, %v241_v36  ;;  %v728_v41 = vpack.c.bf16 %v260_v39, %v259_v38  ;;  %v244_v43 = vld [vmem:[#allocation2 + $0x38] sm:$0xff]  ;;  %v261_v45 = vld [vmem:[#allocation2 + $0xc0] sm:$0xff]  ;;  %v262_v46 = vld [vmem:[#allocation2 + $0xc8] sm:$0xff] }
  0x1f   :  { %715 = vmatpush3.bf16.msra.mxu1 %v714_v24  ;;  %v730_v44 = vpack.c.bf16 %v244_v43, %v243_v42  ;;  %v732_v47 = vpack.c.bf16 %v262_v46, %v261_v45  ;;  %v245_v48 = vld [vmem:[#allocation2 + $0x40] sm:$0xff]  ;;  %v246_v49 = vld [vmem:[#allocation2 + $0x48] sm:$0xff]  ;;  %v263_v51 = vld [vmem:[#allocation2 + $0xd0] sm:$0xff]  ;;  %v61_v17 = vshrl.u32 %v60_v16, 7 }
  0x20   :  { %578 = vmatmul.mubr.msk.f32.vlgmr.msra.gmra.mrb[0].mxu0 %vm75_vm1, %v45_v27  ;;  %748 = vmatprep.subr.bf16.mxu1 %v895_v0  ;;  %v734_v50 = vpack.c.bf16 %v246_v49, %v245_v48  ;;  %v264_v52 = vld [vmem:[#allocation2 + $0xd8] sm:$0xff]  ;;  %v247_v54 = vld [vmem:[#allocation2 + $0x50] sm:$0xff]  ;;  %v265_v57 = vld [vmem:[#allocation2 + $0xe0] sm:$0xff] }
  0x21   :  { %719 = vmatpush3.bf16.msra.mxu0 %v718_v28  ;;  %v736_v53 = vpack.c.bf16 %v264_v52, %v263_v51  ;;  %v248_v55 = vld [vmem:[#allocation2 + $0x58] sm:$0xff]  ;;  %v266_v58 = vld [vmem:[#allocation2 + $0xe8] sm:$0xff]  ;;  %v249_v60 = vld [vmem:[#allocation2 + $0x60] sm:$0xff]  ;;  %v62_v18 = vsub.s32 0, %v61_v17  ;;  %v66_v20 = vsub.s32 1, %v61_v17  ;;  %v70_v21 = vsub.s32 2, %v61_v17 }
  0x22   :  { %656 = vmatmul.mubr.msk.f32.vlgmr.msra.gmra.mrb[0].mxu1 %vm75_vm1, %v45_v27  ;;  %721 = vmatprep.subr.bf16.mxu0 %v720_v29  ;;  %v738_v56 = vpack.c.bf16 %v248_v55, %v247_v54  ;;  %v740_v59 = vpack.c.bf16 %v266_v58, %v265_v57  ;;  %v250_v61 = vld [vmem:[#allocation2 + $0x68] sm:$0xff]  ;;  %v269_v62 = vld [vmem:[#allocation2 + $0x100] sm:$0xff]  ;;  %v267_v4 = vld [vmem:[#allocation2 + $0xf0] sm:$0xff] }
  0x23   :  { %670 = vmatprep.mubr.msk.f32.mxu1 %vm897_vm0, %v896_v1  ;;  %v742_v63 = vpack.c.bf16 %v250_v61, %v249_v60  ;;  %v270_v2 = vld [vmem:[#allocation2 + $0x108] sm:$0xff]  ;;  %v268_v5 = vld [vmem:[#allocation2 + $0xf8] sm:$0xff]  ;;  %v251_v7 = vld [vmem:[#allocation2 + $0x70] sm:$0xff] }
  0x24   :  { %v749_v3 = vpack.c.bf16 %v270_v2, %v269_v62  ;;  %v744_v6 = vpack.c.bf16 %v268_v5, %v267_v4  ;;  %v252_v8 = vld [vmem:[#allocation2 + $0x78] sm:$0xff]  ;;  %v271_v9 = vld [vmem:[#allocation2 + $0x110] sm:$0xff]  ;;  %v273_v13 = vld [vmem:[#allocation2 + $0x120] sm:$0xff] }
  0x25   :  { %723 = vmatpush3.bf16.msra.mxu0 %v722_v34  ;;  %v746_v10 = vpack.c.bf16 %v252_v8, %v251_v7  ;;  %v272_v11 = vld [vmem:[#allocation2 + $0x118] sm:$0xff]  ;;  %v274_v14 = vld [vmem:[#allocation2 + $0x128] sm:$0xf]  ;;  %vm756_vm4 = vmpackc.low %vm285_vm2, %vm898_vm3 }
  0x26   :  { %725 = vmatprep.subr.bf16.mxu0 %v724_v35  ;;  %750 = vmatpush3.bf16.msra.mxu1 %v749_v3  ;;  %v752_v12 = vpack.c.bf16 %v272_v11, %v271_v9  ;;  %v755_v15 = vpack.c.bf16 %v274_v14, %v273_v13  ;;  %v58_v19 = vld [vmem:[%s1116_s2] sm:$0x7]  ;;  %v433_v33 = vld [vmem:[%s1119_s5 + $0x8] sm:$0xff]  ;;  %v434_v37 = vld [vmem:[%s1119_s5 + $0x10] sm:$0xff] }
  0x27   :  { %751 = vmatprep.subr.bf16.mxu1 %v895_v0  ;;  %v63_v22 = vrot.slane %v58_v19, %v62_v18  ;;  %v67_v23 = vrot.slane %v58_v19, %v66_v20  ;;  %v71_v24 = vrot.slane %v58_v19, %v70_v21  ;;  %v432_v32 = vld [vmem:[%s1119_s5] sm:$0xff]  ;;  %v435_v38 = vld [vmem:[%s1119_s5 + $0x18] sm:$0xff]  ;;  %v437_v45 = vld [vmem:[%s1119_s5 + $0x28] sm:$0xff] }
  0x28   :  { %v759_v35 = vpack.c.bf16 %v433_v33, %v432_v32  ;;  %v762_v43 = vpack.c.bf16 %v435_v38, %v434_v37  ;;  %v439_v48 = vld [vmem:[%s1119_s5 + $0x38] sm:$0xff]  ;;  %v441_v51 = vld [vmem:[%s1119_s5 + $0x48] sm:$0xff]  ;;  %v580_v60 = vld [vmem:[%s1118_s4] ss:$0 sm:$0xff] }
  0x29   :  { %727 = vmatpush3.bf16.msra.mxu0 %v726_v40  ;;  %v443_v54 = vld [vmem:[%s1119_s5 + $0x58] sm:$0xff]  ;;  %v583_v2 = vld [vmem:[%s1120_s6] ss:$0 sm:$0xff] }
  0x2a   :  { %729 = vmatprep.subr.bf16.mxu0 %v728_v41  ;;  %753 = vmatpush3.bf16.msra.mxu1 %v752_v12 }
  0x2b   :  { %754 = vmatprep.subr.bf16.mxu1 %v895_v0 }
  0x2d   :  { %731 = vmatpush3.bf16.msra.mxu0 %v730_v44  ;;  %v436_v44 = vld [vmem:[%s1119_s5 + $0x20] sm:$0xff] }
  0x2e   :  { %733 = vmatprep.subr.bf16.mxu0 %v732_v47  ;;  %757 = vmatpush3.bf16.msk.msra.mxu1 %vm756_vm4, %v755_v15  ;;  %v765_v46 = vpack.c.bf16 %v437_v45, %v436_v44  ;;  %v438_v47 = vld [vmem:[%s1119_s5 + $0x30] sm:$0xff] }
  0x2f   :  { %758 = vmatprep.subr.bf16.mxu1 %v895_v0  ;;  %v768_v49 = vpack.c.bf16 %v439_v48, %v438_v47 }
  0x31   :  { %735 = vmatpush3.bf16.msra.mxu0 %v734_v50  ;;  %v440_v50 = vld [vmem:[%s1119_s5 + $0x40] sm:$0xff] }
  0x32   :  { %737 = vmatprep.subr.bf16.mxu0 %v736_v53  ;;  %v771_v52 = vpack.c.bf16 %v441_v51, %v440_v50  ;;  %v442_v53 = vld [vmem:[%s1119_s5 + $0x50] sm:$0xff] }
  0x33   :  { %v774_v55 = vpack.c.bf16 %v443_v54, %v442_v53 }
  0x35   :  { %739 = vmatpush3.bf16.msra.mxu0 %v738_v56  ;;  %v444_v56 = vld [vmem:[%s1119_s5 + $0x60] sm:$0xf] }
  0x36   :  { %741 = vmatprep.subr.bf16.mxu0 %v740_v59 }
  0x39   :  { %743 = vmatpush3.bf16.msra.mxu0 %v742_v63 }
  0x3a   :  { %745 = vmatprep.subr.bf16.mxu0 %v744_v6 }
  0x3d   :  { %747 = vmatpush3.bf16.msra.mxu0 %v746_v10 }
  0xf3   :  { %v145_v25 = vpop.f32.mrb[0].mxu0 }
  0xf4   :  { %v146_v26 = vadd.f32 %v145_v25, %v63_v22  ;;  %v147_v27 = vpop.f32.mrb[1].mxu0 }
  0xf5   :  { %v148_v28 = vadd.f32 %v147_v27, %v67_v23  ;;  %v216_v29 = vpop.f32.mrb[0].mxu1 }
  0xf6   :  { %790 = vtanh.f32 %v146_v26  ;;  %v217_v30 = vadd.f32 %v216_v29, %v71_v24  ;;  %v657_v31 = vpop.f32.mrb[1].mxu1 }
  0xf7   :  { %792 = vtanh.f32 %v148_v28 }
  0xf8   :  { %794 = vtanh.f32 %v217_v30 }
 0x100   :  { %v791_v34 = vpop.eup %790 }
 0x101   :  { %v793_v36 = vpop.eup %792 }
 0x102   :  { %v795_v39 = vpop.eup %794  ;;  %v226_v40 = vcombine.low %v791_v34, %v793_v36  ;;  %v227_v41 = vcombine.high %v791_v34, %v793_v36  ;;  %353 = vmatprep.mubr.f32.mxu0 %v793_v36 }
 0x103   :  { %v228_v42 = vcombine.high %v795_v39, %v795_v39  ;;  %234 = vst.msk [vmem:[#allocation5 + $0x8] sm:$0xf] %vm233_vm5, %v795_v39  ;;  %354 = vmatmul.mubr.f32.vlgmr.msra.gmra.mrb[2].mxu0 %v791_v34  ;;  %671 = vmatmul.mubr.msk.f32.vlgmr.msra.gmra.mrb[2].mxu1 %vm282_vm6, %v795_v39 }
 0x104   :  { %232 = vst [vmem:[#allocation5] sm:$0xff] %v226_v40  ;;  %235 = vst [vmem:[#allocation5 + $0xc] sm:$0xff] %v227_v41  ;;  %760 = vmatpush3.bf16.msra.mxu1 %v759_v35  ;;  %699 = vmatprep.mubr.msk.f32.mxu1 %vm897_vm0, %v896_v1 }
 0x105   :  { %236 = vst.msk [vmem:[#allocation5 + $0x14] sm:$0xf] %vm233_vm5, %v228_v42  ;;  %761 = vmatprep.subr.bf16.mxu1 %v895_v0 }
 0x108   :  { %763 = vmatpush3.bf16.msra.mxu1 %v762_v43 }
 0x109   :  { %764 = vmatprep.subr.bf16.mxu1 %v895_v0 }
 0x10c   :  { %766 = vmatpush3.bf16.msra.mxu1 %v765_v46 }
 0x10d   :  { %767 = vmatprep.subr.bf16.mxu1 %v895_v0 }
 0x110   :  { %769 = vmatpush3.bf16.msra.mxu1 %v768_v49 }
 0x111   :  { %770 = vmatprep.subr.bf16.mxu1 %v895_v0 }
 0x114   :  { %772 = vmatpush3.bf16.msra.mxu1 %v771_v52 }
 0x115   :  { %773 = vmatprep.subr.bf16.mxu1 %v895_v0 }
 0x118   :  { %775 = vmatpush3.bf16.msra.mxu1 %v774_v55 }
 0x119   :  { %697 = vmatprep.subr.mxu1 %v896_v1 }
 0x11c   :  { %698 = vmatpush3.msk.msra.mxu1 %vm285_vm2, %v444_v56 }
 0x1d6   :  { %v623_v57 = vpop.f32.mrb[2].mxu0  ;;  %v425_v58 = vpop.f32.mrb[2].mxu1 }
 0x1d7   :  { %v624_v59 = vpop.f32.mrb[3].mxu0  ;;  %v672_v61 = vpop.f32.mrb[3].mxu1 }
 0x1d8   :  { %v625_v62 = vadd.f32 %v624_v59, %v623_v57 }
 0x1da   :  { %v356_v63 = vadd.f32 %v625_v62, %v580_v60 }
 0x1dc   :  { %v426_v0 = vadd.f32 %v425_v58, %v356_v63 }
 0x1de   :  { %796 = vtanh.f32 %v426_v0 }
 0x1e8   :  { %v797_v1 = vpop.eup %796 }
 0x1e9   :  { %431 = vst.msk [vmem:[#allocation6] sm:$0xff] %vm430_vm7, %v797_v1  ;;  %700 = vmatmul.mubr.msk.f32.vlgmr.msra.gmra.mrb[4].mxu1 %vm430_vm7, %v797_v1 }
 0x2bc   :  { %v524_v3 = vpop.f32.mrb[4].mxu1 }
 0x2bd   :  { %v525_v4 = vadd.f32 %v583_v2, %v524_v3  ;;  %v701_v5 = vpop.f32.mrb[5].mxu1 }
 0x2bf   :  { %529 = vst.msk [vmem:[#allocation8] sm:$0xff] %vm528_vm8, %v525_v4 }
 0x2c0   :  { %534 = vsyncadd [#allocation4], 192  ;;  %s899_s4 = smov [#allocation5]  }
 0x2c1   :  { %s535_s29 = sshll.u32 %s899_s4, 4  ;;  %s536_s29 = int_to_ptr.vmem [resolvable:$true] %s535_s29 }
 0x2c2   :  { %s820_s30 = scalar_lea.vmem %s536_s29, 192  ;;  %s824_s10 = scalar_lea.vmem %s536_s29, 384 }
 0x2c3   :  { %p821_p8 = scmp.ne.s32.totalorder %s536_s29, %s820_s30  ;;  %p825_p9 = scmp.lt.s32.totalorder %s536_s29, %s536_s29 }
 0x2c4   :  { %p826_p10 = scmp.lt.s32.totalorder %s824_s10, %s820_s30 }
 0x2c6   :  { %p827_p11 = por %p826_p10, %p825_p9 }
 0x2c8   :  { %p828_p12 = pnand %p827_p11, %p821_p8 }
 0x2ca   :  { %831 = shalt.err (!%p828_p12)
}
 0x2cb   :  { %s832_s6 = scalar_lea.hbm %s1121_s7, 192 }
 0x2cc   :  { %p833_p13 = scmp.ne.s32.totalorder %s1121_s7, %s832_s6  ;;  %p836_p0 = scmp.lt.u32.totalorder %s832_s6, %s1121_s7 }
 0x2ce   :  { %p838_p1 = pnand %p836_p0, %p833_p13 }
 0x2d0   :  { %841 = shalt.err (!%p838_p1)
}
 0x2d1   :  { %s900_s17 = smov 192   ;;  %s901_s18 = smov 12  }
 0x2d2   :  { %541 = dma.vmem_to_hbm [thread:$0]  %s536_s29, 192, %s1121_s7, [#allocation4], %s900_s17, %s900_s17, %s901_s18  }
 0x2d3   :  { %546 = vsyncadd [#allocation7], 64  ;;  %s902_s21 = smov [#allocation6]  }
 0x2d4   :  { %s547_s22 = sshll.u32 %s902_s21, 4  ;;  %s548_s22 = int_to_ptr.vmem [resolvable:$true] %s547_s22 }
 0x2d5   :  { %s842_s23 = scalar_lea.vmem %s548_s22, 64  ;;  %s846_s24 = scalar_lea.vmem %s548_s22, 128 }
 0x2d6   :  { %p843_p2 = scmp.ne.s32.totalorder %s548_s22, %s842_s23  ;;  %p847_p3 = scmp.lt.s32.totalorder %s548_s22, %s548_s22 }
 0x2d7   :  { %p848_p4 = scmp.lt.s32.totalorder %s846_s24, %s842_s23 }
 0x2d9   :  { %p849_p5 = por %p848_p4, %p847_p3 }
 0x2db   :  { %p850_p6 = pnand %p849_p5, %p843_p2 }
 0x2dd   :  { %853 = shalt.err (!%p850_p6)
}
 0x2de   :  { %s854_s0 = scalar_lea.hbm %s1122_s8, 64 }
 0x2df   :  { %p855_p7 = scmp.ne.s32.totalorder %s1122_s8, %s854_s0  ;;  %p858_p8 = scmp.lt.u32.totalorder %s854_s0, %s1122_s8 }
 0x2e1   :  { %p860_p9 = pnand %p858_p8, %p855_p7 }
 0x2e3   :  { %863 = shalt.err (!%p860_p9)
}
 0x2e4   :  { %s903_s2 = smov 64   ;;  %s904_s28 = smov 4  }
 0x2e5   :  { %553 = dma.vmem_to_hbm [thread:$0]  %s548_s22, 64, %s1122_s8, [#allocation7], %s903_s2, %s903_s2, %s904_s28  }
 0x2e6   :  { %558 = vsyncadd [#allocation7], 64  ;;  %s905_s29 = smov [#allocation8]  }
 0x2e7   :  { %s559_s30 = sshll.u32 %s905_s29, 4  ;;  %s560_s30 = int_to_ptr.vmem [resolvable:$true] %s559_s30 }
 0x2e8   :  { %s864_s10 = scalar_lea.vmem %s560_s30, 64  ;;  %s868_s11 = scalar_lea.vmem %s560_s30, 128 }
 0x2e9   :  { %p865_p10 = scmp.ne.s32.totalorder %s560_s30, %s864_s10  ;;  %p869_p11 = scmp.lt.s32.totalorder %s560_s30, %s560_s30 }
 0x2ea   :  { %p870_p12 = scmp.lt.s32.totalorder %s868_s11, %s864_s10 }
 0x2ec   :  { %p871_p13 = por %p870_p12, %p869_p11 }
 0x2ee   :  { %p872_p0 = pnand %p871_p13, %p865_p10 }
 0x2f0   :  { %875 = shalt.err (!%p872_p0)
}
 0x2f1   :  { %s876_s13 = scalar_lea.hbm %s1123_s9, 64 }
 0x2f2   :  { %p877_p1 = scmp.ne.s32.totalorder %s1123_s9, %s876_s13  ;;  %p880_p2 = scmp.lt.u32.totalorder %s876_s13, %s1123_s9 }
 0x2f4   :  { %p882_p3 = pnand %p880_p2, %p877_p1 }
 0x2f6   :  { %885 = shalt.err (!%p882_p3)
}
 0x2f7   :  { %565 = dma.vmem_to_hbm [thread:$0]  %s560_s30, 64, %s1123_s9, [#allocation7], %s903_s2, %s903_s2, %s904_s28  }
 0x2f8   :  { %888 = dma.done.wait [#allocation4], 384  }
 0x2f9   :  { %889 = vsyncadd [#allocation4], 4294966912 }
 0x2fa   :  { %890 = dma.done.wait [#allocation7], 256  }
 0x2fb   :  { %891 = vsyncadd [#allocation7], 4294967040 }
 0x2fc   :  { %575 = vsyncpa [#allocation3], 1 }
 0x2fd   :  { %576 = vsyncpa [#allocation4], 1 }
 0x2fe   :  { %577 = vsyncpa [#allocation7], 1 }

</bundles_post_ra>
